<compile_context>
chip_gen: v5e
topology: v5e:2x2
jax: 0.10.0
libtpu: 0.0.40
codegen_flags: <defaults>
</compile_context>

<pallas_src>
import functools

import jax
import jax.numpy as jnp
from jax.experimental import pallas as pl
from jax.experimental.pallas import tpu as pltpu


def _round_up(n, m):
    return ((n + m - 1) // m) * m


def _acmodel_kernel(x_ref, w1_ref, w23_ref, wh_ref, b_ref, logp_ref, val_ref,
                    *, n_actions):
    hidden = w1_ref.shape[1]
    head_w = wh_ref.shape[1]

    x = x_ref[...]
    b = b_ref[...]

    # feature_net: Linear -> ReLU, three times (f32 throughout)
    h = jnp.dot(x, w1_ref[...], preferred_element_type=jnp.float32) + b[0:1, :hidden]
    h = jnp.maximum(h, 0.0)
    h = jnp.dot(h, w23_ref[0], preferred_element_type=jnp.float32) + b[1:2, :hidden]
    h = jnp.maximum(h, 0.0)
    h = jnp.dot(h, w23_ref[1], preferred_element_type=jnp.float32) + b[2:3, :hidden]
    h = jnp.maximum(h, 0.0)

    # fused actor+critic head: lanes 0..A-1 = actor logits, lane A = critic value
    y = jnp.dot(h, wh_ref[...], preferred_element_type=jnp.float32) + b[3:4, :head_w]

    # log_softmax over the actor lanes only (masked, numerically stabilized)
    lane = jax.lax.broadcasted_iota(jnp.int32, y.shape, 1)
    act = lane < n_actions
    masked = jnp.where(act, y, -jnp.inf)
    m = jnp.max(masked, axis=-1, keepdims=True)
    e = jnp.exp(masked - m)                           # exp(-inf) = 0 on padded lanes
    lse = m + jnp.log(jnp.sum(e, axis=-1, keepdims=True))

    # narrow outputs: only the useful bytes go back to HBM
    logp_ref[...] = (y - lse)[:, :n_actions]
    # extract the critic lane via a lane-masked reduction (no odd-offset slice)
    val_ref[...] = jnp.sum(jnp.where(lane == n_actions, y, 0.0),
                           axis=-1, keepdims=True)


def pack_params(params):
    """One-time operand packing (hoisted out of the per-step forward path)."""
    w1, b1, w2, b2, w3, b3, wa, ba, wc, bc = params
    hidden = w1.shape[1]
    A = wa.shape[1]

    head_pad = _round_up(A + 1, 128)                  # lane-dense fused head width
    bias_pad = max(hidden, head_pad)

    w23 = jnp.stack([w2, w3], axis=0)                 # (2, hidden, hidden)

    wh = jnp.zeros((hidden, head_pad), jnp.float32)   # actor | critic | zero pad
    wh = wh.at[:, :A].set(wa).at[:, A].set(wc[:, 0])

    bpack = jnp.zeros((4, bias_pad), jnp.float32)     # one tile instead of 5 bias DMAs
    bpack = bpack.at[0, :hidden].set(b1[0])
    bpack = bpack.at[1, :hidden].set(b2[0])
    bpack = bpack.at[2, :hidden].set(b3[0])
    bpack = bpack.at[3, :A].set(ba[0]).at[3, A].set(bc[0, 0])

    return (w1, w23, wh, bpack, A)


def _choose_bm(B):
    """Batch tile: single tile for small B; otherwise >= 2 tiles (v7x megacore),
    512-1024 rows per tile to amortize per-grid-step overhead."""
    if B <= 512:
        return _round_up(B, 8)
    return min(1024, _round_up((B + 1) // 2, 8))


def acmodel_forward(x, packed):
    """x: (B, obs_dim) float32. packed: output of pack_params.
    Returns (log_probs (B, A), value (B,))."""
    w1, w23, wh, bpack, A = packed
    B, obs_dim = x.shape
    hidden = w1.shape[1]
    head_pad = wh.shape[1]
    bias_pad = bpack.shape[1]

    # batch tiling: weights resident, x / outputs pipelined over the grid
    bm = _choose_bm(B)
    n_tiles = pl.cdiv(B, bm)
    Bp = n_tiles * bm
    if Bp != B:
        x = jnp.pad(x, ((0, Bp - B), (0, 0)))

    kernel = functools.partial(_acmodel_kernel, n_actions=A)

    logp, value = pl.pallas_call(
        kernel,
        out_shape=(jax.ShapeDtypeStruct((Bp, A), jnp.float32),
                   jax.ShapeDtypeStruct((Bp, 1), jnp.float32)),
        grid=(n_tiles,),
        in_specs=[
            pl.BlockSpec((bm, obs_dim), lambda i: (i, 0)),           # x: tiled over batch
            pl.BlockSpec((obs_dim, hidden), lambda i: (0, 0)),       # w1: resident
            pl.BlockSpec((2, hidden, hidden), lambda i: (0, 0, 0)),  # w2|w3 stacked
            pl.BlockSpec((hidden, head_pad), lambda i: (0, 0)),      # fused head weight
            pl.BlockSpec((4, bias_pad), lambda i: (0, 0)),           # packed biases
        ],
        out_specs=(
            pl.BlockSpec((bm, A), lambda i: (i, 0)),                 # log-probs, narrow
            pl.BlockSpec((bm, 1), lambda i: (i, 0)),                 # critic value
        ),
        compiler_params=pltpu.CompilerParams(
            dimension_semantics=("parallel",)),                      # megacore on v7x
    )(x, w1, w23, wh, bpack)

    if Bp != B:
        logp = logp[:B]
        value = value[:B]
    return logp, value[:, 0]


def init_linear(key, in_dim, out_dim):
    """Matches init_params: weight ~ N(0,1), row-normalized over input dim; bias 0.

    PyTorch stores weight as (out, in) and computes x @ W^T; we generate in that
    layout, normalize each output row, then transpose to (in, out)."""
    w = jax.random.normal(key, (out_dim, in_dim), dtype=jnp.float32)
    w = w / jnp.sqrt(jnp.sum(w * w, axis=1, keepdims=True))
    b = jnp.zeros((1, out_dim), dtype=jnp.float32)
    return w.T, b


def make_params(key, obs_dim, hidden, n_actions):
    k1, k2, k3, ka, kc = jax.random.split(key, 5)
    w1, b1 = init_linear(k1, obs_dim, hidden)
    w2, b2 = init_linear(k2, hidden, hidden)
    w3, b3 = init_linear(k3, hidden, hidden)
    wa, ba = init_linear(ka, hidden, n_actions)
    wc, bc = init_linear(kc, hidden, 1)
    return (w1, b1, w2, b2, w3, b3, wa, ba, wc, bc)


def _ref_forward(x, params):
    """Pure-JAX reference (mirrors the PyTorch forward)."""
    w1, b1, w2, b2, w3, b3, wa, ba, wc, bc = params
    h = jnp.maximum(x @ w1 + b1, 0.0)
    h = jnp.maximum(h @ w2 + b2, 0.0)
    h = jnp.maximum(h @ w3 + b3, 0.0)
    logits = h @ wa + ba
    logp = jax.nn.log_softmax(logits, axis=-1)
    value = (h @ wc + bc)[:, 0]
    return logp, value


if __name__ == "__main__":
    key = jax.random.PRNGKey(0)
    kx, kp = jax.random.split(key)

    batch = 2
    obs_dim = 16          # obs_space['image'][0] == flattened image feature size
    hidden = 64           # ac_hidden_dim_size (module default)
    n_actions = 8         # action_space.n

    # obs.image is reshaped to (B, -1) in the module; we construct it flat.
    x = jax.random.normal(kx, (batch, obs_dim), dtype=jnp.float32)
    params = make_params(kp, obs_dim, hidden, n_actions)
    packed = pack_params(params)          # hoisted: done once, not per forward

    log_probs, value = acmodel_forward(x, packed)
    jax.block_until_ready((log_probs, value))

    # correctness vs pure-JAX reference + log_softmax sanity
    ref_logp, ref_val = _ref_forward(x, params)
    assert log_probs.shape == (batch, n_actions)
    assert value.shape == (batch,)
    assert jnp.allclose(log_probs, ref_logp, atol=1e-5)
    assert jnp.allclose(value, ref_val, atol=1e-5)
    assert jnp.allclose(jnp.sum(jnp.exp(log_probs), axis=1), 1.0, atol=1e-5)

    print("KERNEL_OK")
</pallas_src>

<mosaic_0001>
module attributes {stable_mosaic.version = 11 : i64} {
  func.func @_acmodel_kernel(%arg0: i32, %arg1: memref<8x16xf32, #tpu.memory_space<vmem>>, %arg2: memref<16x64xf32, #tpu.memory_space<vmem>>, %arg3: memref<2x64x64xf32, #tpu.memory_space<vmem>>, %arg4: memref<64x128xf32, #tpu.memory_space<vmem>>, %arg5: memref<4x128xf32, #tpu.memory_space<vmem>>, %arg6: memref<8x8xf32, #tpu.memory_space<vmem>>, %arg7: memref<8x1xf32, #tpu.memory_space<vmem>>) attributes {dimension_semantics = [#tpu.dimension_semantics<parallel>], iteration_bounds = array<i64: 1>, scalar_prefetch = 0 : i64, scratch_operands = 0 : i64, tpu.core_type = #tpu.core_type<tc>, window_params = [{transform_indices = @transform_0, window_bounds = array<i64: 8, 16>}, {pipeline_mode = #tpu.pipeline_mode<synchronous>, transform_indices = @transform_1, window_bounds = array<i64: 16, 64>}, {pipeline_mode = #tpu.pipeline_mode<synchronous>, transform_indices = @transform_2, window_bounds = array<i64: 2, 64, 64>}, {pipeline_mode = #tpu.pipeline_mode<synchronous>, transform_indices = @transform_3, window_bounds = array<i64: 64, 128>}, {pipeline_mode = #tpu.pipeline_mode<synchronous>, transform_indices = @transform_4, window_bounds = array<i64: 4, 128>}, {transform_indices = @transform_5, window_bounds = array<i64: 8, 8>}, {transform_indices = @transform_6, window_bounds = array<i64: 8, 1>}]} {
    %c0 = arith.constant 0 : index
    %c0_0 = arith.constant 0 : index
    %0 = vector.load %arg1[%c0, %c0_0] : memref<8x16xf32, #tpu.memory_space<vmem>>, vector<8x16xf32>
    %c0_1 = arith.constant 0 : index
    %c0_2 = arith.constant 0 : index
    %1 = vector.load %arg5[%c0_1, %c0_2] : memref<4x128xf32, #tpu.memory_space<vmem>>, vector<4x128xf32>
    %c0_3 = arith.constant 0 : index
    %c0_4 = arith.constant 0 : index
    %2 = vector.load %arg2[%c0_3, %c0_4] : memref<16x64xf32, #tpu.memory_space<vmem>>, vector<16x64xf32>
    %cst = arith.constant dense<0.000000e+00> : vector<8x64xf32>
    %3 = tpu.matmul %0, %2, %cst {dimension_numbers = #tpu.dot_dimension_numbers<[1], [0], [0], [1], [0, 0, 1, 1], [], []>} : vector<8x16xf32>, vector<16x64xf32>, vector<8x64xf32> -> vector<8x64xf32>
    %4 = vector.extract_strided_slice %1 {offsets = [0, 0], sizes = [1, 64], strides = [1, 1]} : vector<4x128xf32> to vector<1x64xf32>
    %5 = vector.broadcast %4 : vector<1x64xf32> to vector<8x64xf32>
    %6 = arith.addf %3, %5 : vector<8x64xf32>
    %cst_5 = arith.constant 0.000000e+00 : f32
    %7 = vector.broadcast %cst_5 : f32 to vector<8x64xf32>
    %8 = arith.maximumf %6, %7 : vector<8x64xf32>
    %c0_6 = arith.constant 0 : index
    %c0_7 = arith.constant 0 : index
    %c0_8 = arith.constant 0 : index
    %9 = vector.load %arg3[%c0_6, %c0_7, %c0_8] : memref<2x64x64xf32, #tpu.memory_space<vmem>>, vector<1x64x64xf32>
    %10 = vector.shape_cast %9 : vector<1x64x64xf32> to vector<64x64xf32>
    %cst_9 = arith.constant dense<0.000000e+00> : vector<8x64xf32>
    %11 = tpu.matmul %8, %10, %cst_9 {dimension_numbers = #tpu.dot_dimension_numbers<[1], [0], [0], [1], [0, 0, 1, 1], [], []>} : vector<8x64xf32>, vector<64x64xf32>, vector<8x64xf32> -> vector<8x64xf32>
    %12 = vector.extract_strided_slice %1 {offsets = [1, 0], sizes = [1, 64], strides = [1, 1]} : vector<4x128xf32> to vector<1x64xf32>
    %13 = vector.broadcast %12 : vector<1x64xf32> to vector<8x64xf32>
    %14 = arith.addf %11, %13 : vector<8x64xf32>
    %cst_10 = arith.constant 0.000000e+00 : f32
    %15 = vector.broadcast %cst_10 : f32 to vector<8x64xf32>
    %16 = arith.maximumf %14, %15 : vector<8x64xf32>
    %c1 = arith.constant 1 : index
    %c0_11 = arith.constant 0 : index
    %c0_12 = arith.constant 0 : index
    %17 = vector.load %arg3[%c1, %c0_11, %c0_12] : memref<2x64x64xf32, #tpu.memory_space<vmem>>, vector<1x64x64xf32>
    %18 = vector.shape_cast %17 : vector<1x64x64xf32> to vector<64x64xf32>
    %cst_13 = arith.constant dense<0.000000e+00> : vector<8x64xf32>
    %19 = tpu.matmul %16, %18, %cst_13 {dimension_numbers = #tpu.dot_dimension_numbers<[1], [0], [0], [1], [0, 0, 1, 1], [], []>} : vector<8x64xf32>, vector<64x64xf32>, vector<8x64xf32> -> vector<8x64xf32>
    %20 = vector.extract_strided_slice %1 {offsets = [2, 0], sizes = [1, 64], strides = [1, 1]} : vector<4x128xf32> to vector<1x64xf32>
    %21 = vector.broadcast %20 : vector<1x64xf32> to vector<8x64xf32>
    %22 = arith.addf %19, %21 : vector<8x64xf32>
    %cst_14 = arith.constant 0.000000e+00 : f32
    %23 = vector.broadcast %cst_14 : f32 to vector<8x64xf32>
    %24 = arith.maximumf %22, %23 : vector<8x64xf32>
    %c0_15 = arith.constant 0 : index
    %c0_16 = arith.constant 0 : index
    %25 = vector.load %arg4[%c0_15, %c0_16] : memref<64x128xf32, #tpu.memory_space<vmem>>, vector<64x128xf32>
    %cst_17 = arith.constant dense<0.000000e+00> : vector<8x128xf32>
    %26 = tpu.matmul %24, %25, %cst_17 {dimension_numbers = #tpu.dot_dimension_numbers<[1], [0], [0], [1], [0, 0, 1, 1], [], []>} : vector<8x64xf32>, vector<64x128xf32>, vector<8x128xf32> -> vector<8x128xf32>
    %27 = vector.extract_strided_slice %1 {offsets = [3, 0], sizes = [1, 128], strides = [1, 1]} : vector<4x128xf32> to vector<1x128xf32>
    %28 = vector.broadcast %27 : vector<1x128xf32> to vector<8x128xf32>
    %29 = arith.addf %26, %28 : vector<8x128xf32>
    %30 = tpu.iota {dimensions = array<i32: 1>} : vector<8x128xi32>
    %c8_i32 = arith.constant 8 : i32
    %31 = vector.broadcast %c8_i32 : i32 to vector<8x128xi32>
    %32 = arith.cmpi slt, %30, %31 : vector<8x128xi32>
    %cst_18 = arith.constant 0xFF800000 : f32
    %33 = vector.broadcast %cst_18 : f32 to vector<8x128xf32>
    %34 = arith.select %32, %29, %33 : vector<8x128xi1>, vector<8x128xf32>
    %cst_19 = arith.constant dense<0xFF800000> : vector<8xf32>
    %35 = vector.multi_reduction <maximumf>, %34, %cst_19 [1] : vector<8x128xf32> to vector<8xf32>
    %36 = vector.shape_cast %35 : vector<8xf32> to vector<8x1xf32>
    %37 = vector.broadcast %36 : vector<8x1xf32> to vector<8x128xf32>
    %38 = arith.subf %34, %37 : vector<8x128xf32>
    %39 = math.exp %38 : vector<8x128xf32>
    %cst_20 = arith.constant dense<0.000000e+00> : vector<8xf32>
    %40 = vector.multi_reduction <add>, %39, %cst_20 [1] : vector<8x128xf32> to vector<8xf32>
    %41 = vector.shape_cast %40 : vector<8xf32> to vector<8x1xf32>
    %42 = math.log %41 : vector<8x1xf32>
    %43 = arith.addf %36, %42 : vector<8x1xf32>
    %44 = vector.broadcast %43 : vector<8x1xf32> to vector<8x128xf32>
    %45 = arith.subf %29, %44 : vector<8x128xf32>
    %46 = vector.extract_strided_slice %45 {offsets = [0, 0], sizes = [8, 8], strides = [1, 1]} : vector<8x128xf32> to vector<8x8xf32>
    %c0_21 = arith.constant 0 : index
    %c0_22 = arith.constant 0 : index
    %47 = vector.load %arg6[%c0_21, %c0_22] : memref<8x8xf32, #tpu.memory_space<vmem>>, vector<8x8xf32>
    tpu.vector_store %arg6[%c0_21, %c0_22], %46 {strides = array<i32>} : memref<8x8xf32, #tpu.memory_space<vmem>>, vector<8x8xf32>,
    %c8_i32_23 = arith.constant 8 : i32
    %48 = vector.broadcast %c8_i32_23 : i32 to vector<8x128xi32>
    %49 = arith.cmpi eq, %30, %48 : vector<8x128xi32>
    %cst_24 = arith.constant 0.000000e+00 : f32
    %50 = vector.broadcast %cst_24 : f32 to vector<8x128xf32>
    %51 = arith.select %49, %29, %50 : vector<8x128xi1>, vector<8x128xf32>
    %cst_25 = arith.constant dense<0.000000e+00> : vector<8xf32>
    %52 = vector.multi_reduction <add>, %51, %cst_25 [1] : vector<8x128xf32> to vector<8xf32>
    %53 = vector.shape_cast %52 : vector<8xf32> to vector<8x1xf32>
    %c0_26 = arith.constant 0 : index
    %c0_27 = arith.constant 0 : index
    %54 = vector.load %arg7[%c0_26, %c0_27] : memref<8x1xf32, #tpu.memory_space<vmem>>, vector<8x1xf32>
    tpu.vector_store %arg7[%c0_26, %c0_27], %53 {strides = array<i32>} : memref<8x1xf32, #tpu.memory_space<vmem>>, vector<8x1xf32>,
    return
  }
  func.func @transform_0(%arg0: i32) -> (i32, i32) {
    %c0_i32 = arith.constant 0 : i32
    %c0_i32_0 = arith.constant 0 : i32
    return %arg0, %c0_i32 : i32, i32
  }
  func.func @transform_1(%arg0: i32) -> (i32, i32) {
    %c0_i32 = arith.constant 0 : i32
    %c0_i32_0 = arith.constant 0 : i32
    %c0_i32_1 = arith.constant 0 : i32
    return %c0_i32, %c0_i32_0 : i32, i32
  }
  func.func @transform_2(%arg0: i32) -> (i32, i32, i32) {
    %c0_i32 = arith.constant 0 : i32
    %c0_i32_0 = arith.constant 0 : i32
    %c0_i32_1 = arith.constant 0 : i32
    %c0_i32_2 = arith.constant 0 : i32
    return %c0_i32, %c0_i32_0, %c0_i32_1 : i32, i32, i32
  }
  func.func @transform_3(%arg0: i32) -> (i32, i32) {
    %c0_i32 = arith.constant 0 : i32
    %c0_i32_0 = arith.constant 0 : i32
    %c0_i32_1 = arith.constant 0 : i32
    return %c0_i32, %c0_i32_0 : i32, i32
  }
  func.func @transform_4(%arg0: i32) -> (i32, i32) {
    %c0_i32 = arith.constant 0 : i32
    %c0_i32_0 = arith.constant 0 : i32
    %c0_i32_1 = arith.constant 0 : i32
    return %c0_i32, %c0_i32_0 : i32, i32
  }
  func.func @transform_5(%arg0: i32) -> (i32, i32) {
    %c0_i32 = arith.constant 0 : i32
    %c0_i32_0 = arith.constant 0 : i32
    return %arg0, %c0_i32 : i32, i32
  }
  func.func @transform_6(%arg0: i32) -> (i32, i32) {
    %c0_i32 = arith.constant 0 : i32
    %c0_i32_0 = arith.constant 0 : i32
    return %arg0, %c0_i32 : i32, i32
  }
}

</mosaic_0001>

<bundles_post_ra>
// kernel: tpu_custom_call.1
= control target key start
LH: loop header
LB: loop body
LE: loop exit
PB: predicated region body
PF: predicated region fallthrough
CT: control target
= control target key end

     0   :  { %12 = vsyncpa [#allocation3], 0  ;;  %s508_s0 = inlined_call_operand.hbm [shape: f32[8,16], index: 0, kind: input, shape index: {}]   ;;  %s509_s1 = inlined_call_operand.hbm [shape: f32[16,64], index: 1, kind: input, shape index: {}]   ;;  %s510_s2 = inlined_call_operand.hbm [shape: f32[2,64,64], index: 2, kind: input, shape index: {}]   ;;  %s511_s3 = inlined_call_operand.hbm [shape: f32[64,128], index: 3, kind: input, shape index: {}]   ;;  %s512_s4 = inlined_call_operand.hbm [shape: f32[4,128], index: 4, kind: input, shape index: {}]   ;;  %s513_s5 = inlined_call_operand.hbm [shape: f32[8,8], index: 5, kind: output, shape index: {0}]   ;;  %s514_s6 = inlined_call_operand.vmem [shape: f32[8,1], index: 6, kind: output, shape index: {1}]  }
   0x1   :  { %13 = vsyncpa [#allocation6], 0 }
   0x2   :  { %14 = vsyncpa [#allocation9], 0  ;;  %s31_s23 = sshll.u32 %s509_s1, 4  ;;  %s32_s23 = int_to_ptr.hbm [resolvable:$true] %s31_s23 }
   0x3   :  { %15 = vsyncpa [#allocation4], 0  ;;  %s441_s24 = smov [#allocation5]   ;;  %s57_s28 = sshll.u32 %s511_s3, 4  ;;  %s58_s28 = int_to_ptr.hbm [resolvable:$true] %s57_s28 }
   0x4   :  { %s33_s25 = sshll.u32 %s441_s24, 4  ;;  %s442_s29 = smov 128   ;;  %s34_s25 = int_to_ptr.vmem [resolvable:$true] %s33_s25 }
   0x5   :  { %s443_s30 = smov 8   ;;  %s444_s7 = smov [#allocation8]  }
   0x6   :  { %39 = dma.hbm_to_vmem [thread:$0]  %s32_s23, 256, %s34_s25, [#allocation6], %s442_s29, %s442_s29, %s443_s30  }
   0x7   :  { %s59_s8 = sshll.u32 %s444_s7, 4  ;;  %s21_s11 = sshll.u32 %s508_s0, 4  ;;  %s60_s8 = int_to_ptr.vmem [resolvable:$true] %s59_s8  ;;  %s22_s11 = int_to_ptr.hbm [resolvable:$true] %s21_s11 }
   0x8   :  { %65 = dma.hbm_to_vmem [thread:$0]  %s58_s28, 1024, %s60_s8, [#allocation9], %s442_s29, %s442_s29, %s443_s30  }
   0x9   :  { %s44_s13 = sshll.u32 %s510_s2, 4  ;;  %s445_s14 = smov [#allocation2]   ;;  %s45_s13 = int_to_ptr.hbm [resolvable:$true] %s44_s13 }
   0xa   :  { %s23_s15 = sshll.u32 %s445_s14, 4  ;;  %s446_s3 = smov [#allocation7]   ;;  %s24_s15 = int_to_ptr.vmem [resolvable:$true] %s23_s15 }
   0xb   :  { %26 = dma.hbm_to_vmem [thread:$0]  %s22_s11, 128, %s24_s15, [#allocation3]  }
   0xc   :  { %s46_s16 = sshll.u32 %s446_s3, 4  ;;  %s71_s19 = sshll.u32 %s512_s4, 4  ;;  %s47_s16 = int_to_ptr.vmem [resolvable:$true] %s46_s16  ;;  %s72_s19 = int_to_ptr.hbm [resolvable:$true] %s71_s19 }
   0xd   :  { %52 = dma.hbm_to_vmem [thread:$0]  %s45_s13, 2048, %s47_s16, [#allocation6], %s442_s29, %s442_s29, %s443_s30  }
   0xe   :  { %s447_s0 = smov [#allocation10]  }
   0xf   :  { %s73_s20 = sshll.u32 %s447_s0, 4  ;;  %s74_s20 = int_to_ptr.vmem [resolvable:$true] %s73_s20 }
  0x10   :  { %76 = dma.hbm_to_vmem [thread:$0]  %s72_s19, 64, %s74_s20, [#allocation9]  }
  0x11   :  { %433 = dma.done.wait [#allocation3], 128  }
  0x12   :  { %434 = vsyncadd [#allocation3], 4294967168 }
  0x13   :  { %435 = dma.done.wait [#allocation6], 2304  }
  0x14   :  { %436 = vsyncadd [#allocation6], 4294964992 }
  0x15   :  { %437 = dma.done.wait [#allocation9], 1088  }
  0x16   :  { %438 = vsyncadd [#allocation9], 4294966208  ;;  %v100_v0 = vld [vmem:[#allocation5 + $0x8] sm:$0xff]  ;;  %v99_v1 = vld [vmem:[#allocation5] sm:$0xff]  ;;  %vm102_vm0 = vcmask 130048   ;;  %vm136_vm1 = vcmask 523264   ;;  %v227_v40 = vlaneseq }
  0x17   :  { %120 = vmatpush.msra.mxu0 %v100_v0  ;;  %v97_v2 = vld [vmem:[#allocation2] sm:$0xff]  ;;  %v134_v3 = vld [vmem:[#allocation7 + $0x38] sm:$0xff]  ;;  %v133_v4 = vld [vmem:[#allocation7 + $0x30] sm:$0xff]  ;;  %vm248_vm4 = vcmask 7168   ;;  %s448_s21 = smov [#allocation11]   ;;  %s257_s25 = sshll.u32 %s513_s5, 4  ;;  %s258_s25 = int_to_ptr.hbm [resolvable:$true] %s257_s25 }
  0x18   :  { %148 = vmatpush.msra.mxu1 %v134_v3  ;;  %v132_v5 = vld [vmem:[#allocation7 + $0x28] sm:$0xff]  ;;  %v131_v6 = vld [vmem:[#allocation7 + $0x20] sm:$0xff]  ;;  %v130_v7 = vld [vmem:[#allocation7 + $0x18] sm:$0xff]  ;;  %v228_v41 = vand.u32 127, %v227_v40  ;;  %s255_s22 = sshll.u32 %s448_s21, 4  ;;  %vm242_vm5 = vcmask 64512   ;;  %s256_s22 = int_to_ptr.vmem [resolvable:$true] %s255_s22 }
  0x19   :  { %121 = vmatpush.msra.mxu0 %v99_v1  ;;  %v129_v8 = vld [vmem:[#allocation7 + $0x10] sm:$0xff]  ;;  %v128_v9 = vld [vmem:[#allocation7 + $0x8] sm:$0xff]  ;;  %v127_v10 = vld [vmem:[#allocation7] sm:$0xff] }
  0x1a   :  { %273 = vmatmul.msk.f32.vlgmr.msra.gmra.mxu0 %vm102_vm0, %v97_v2  ;;  %149 = vmatpush.msra.mxu1 %v133_v4  ;;  %v169_v11 = vld [vmem:[#allocation7 + $0x78] sm:$0xff]  ;;  %v168_v12 = vld [vmem:[#allocation7 + $0x70] sm:$0xff]  ;;  %v167_v13 = vld [vmem:[#allocation7 + $0x68] sm:$0xff]  ;;  %vm244_vm2 = vcmp.eq.s32.totalorder %v228_v41, 8  ;;  %vm229_vm3 = vcmp.lt.s32.totalorder %v228_v41, 8 }
  0x1b   :  { %182 = vmatpush.msra.mxu2 %v169_v11  ;;  %v166_v14 = vld [vmem:[#allocation7 + $0x60] sm:$0xff]  ;;  %v165_v15 = vld [vmem:[#allocation7 + $0x58] sm:$0xff]  ;;  %v164_v21 = vld [vmem:[#allocation7 + $0x50] sm:$0xff] }
  0x1c   :  { %150 = vmatpush.msra.mxu1 %v132_v5  ;;  %v98_v16 = vld [vmem:[#allocation10] sm:$0xf]  ;;  %v163_v22 = vld [vmem:[#allocation7 + $0x48] sm:$0xff]  ;;  %v202_v24 = vld [vmem:[#allocation8 + $0x38] sm:$0xff] }
  0x1d   :  { %183 = vmatpush.msra.mxu2 %v168_v12  ;;  %v101_v17 = vperm.slane %v98_v16, 0  ;;  %v162_v23 = vld [vmem:[#allocation7 + $0x40] sm:$0xff]  ;;  %v201_v25 = vld [vmem:[#allocation8 + $0x30] sm:$0xff]  ;;  %215 = vmatpush.msra.mxu3 %v202_v24  ;;  %v200_v26 = vld [vmem:[#allocation8 + $0x28] sm:$0xff]  ;;  %v135_v29 = vperm.slane %v98_v16, 1  ;;  %v170_v36 = vperm.slane %v98_v16, 2 }
  0x1e   :  { %151 = vmatpush.msra.mxu1 %v131_v6  ;;  %v199_v27 = vld [vmem:[#allocation8 + $0x20] sm:$0xff]  ;;  %v198_v28 = vld [vmem:[#allocation8 + $0x18] sm:$0xff]  ;;  %v197_v33 = vld [vmem:[#allocation8 + $0x10] sm:$0xff]  ;;  %v203_v42 = vperm.slane %v98_v16, 3 }
  0x1f   :  { %184 = vmatpush.msra.mxu2 %v167_v13  ;;  %216 = vmatpush.msra.mxu3 %v201_v25  ;;  %v196_v34 = vld [vmem:[#allocation8 + $0x8] sm:$0xff]  ;;  %v195_v35 = vld [vmem:[#allocation8] sm:$0xff] }
  0x20   :  { %152 = vmatpush.msra.mxu1 %v130_v7 }
  0x21   :  { %185 = vmatpush.msra.mxu2 %v166_v14  ;;  %217 = vmatpush.msra.mxu3 %v200_v26 }
  0x22   :  { %153 = vmatpush.msra.mxu1 %v129_v8 }
  0x23   :  { %186 = vmatpush.msra.mxu2 %v165_v15  ;;  %218 = vmatpush.msra.mxu3 %v199_v27 }
  0x24   :  { %154 = vmatpush.msra.mxu1 %v128_v9 }
  0x25   :  { %187 = vmatpush.msra.mxu2 %v164_v21  ;;  %219 = vmatpush.msra.mxu3 %v198_v28 }
  0x26   :  { %155 = vmatpush.msra.mxu1 %v127_v10 }
  0x27   :  { %188 = vmatpush.msra.mxu2 %v163_v22  ;;  %220 = vmatpush.msra.mxu3 %v197_v33 }
  0x29   :  { %189 = vmatpush.msra.mxu2 %v162_v23  ;;  %221 = vmatpush.msra.mxu3 %v196_v34 }
  0x2b   :  { %222 = vmatpush.msra.mxu3 %v195_v35 }
  0x97   :  { %v123_v18 = vpop.f32.mrf.mxu0 }
  0x98   :  { %v124_v19 = vadd.f32 %v123_v18, %v101_v17 }
  0x9a   :  { %v126_v20 = vmax.f32 %v124_v19, 0.0 }
  0x9c   :  { %274 = vmatmul.msk.f32.vlgmr.msra.gmra.mxu1 %vm136_vm1, %v126_v20 }
 0x119   :  { %v157_v30 = vpop.f32.mrf.mxu1 }
 0x11a   :  { %v158_v31 = vadd.f32 %v157_v30, %v135_v29 }
 0x11c   :  { %v160_v32 = vmax.f32 %v158_v31, 0.0 }
 0x11e   :  { %275 = vmatmul.msk.f32.vlgmr.msra.gmra.mxu2 %vm136_vm1, %v160_v32 }
 0x1a1   :  { %v191_v37 = vpop.f32.mrf.mxu2 }
 0x1a2   :  { %v192_v38 = vadd.f32 %v191_v37, %v170_v36 }
 0x1a4   :  { %v194_v39 = vmax.f32 %v192_v38, 0.0 }
 0x1a6   :  { %276 = vmatmul.msk.f32.vlgmr.msra.gmra.mxu3 %vm136_vm1, %v194_v39 }
 0x229   :  { %v224_v43 = vpop.f32.mrf.mxu3 }
 0x22a   :  { %v225_v44 = vadd.f32 %v224_v43, %v203_v42 }
 0x22c   :  { %v245_v45 = vsel %vm244_vm2, %v225_v44, 0.0  ;;  %v230_v46 = vsel %vm229_vm3, %v225_v44, -inf }
 0x22d   :  { %246 = vadd.xlane.f32.xlu1 %v245_v45  ;;  %231 = vmax.xlane.f32.xlu0 %v230_v46 }
 0x2a0   :  { %v247_v47 = vpop.xlane.xlu1 %246  ;;  %v232_v48 = vpop.xlane.xlu0 %231 }
 0x2a1   :  { %249 = vst.msk [vmem:[%s514_s6] sm:$0xff] %vm248_vm4, %v247_v47  ;;  %v233_v49 = vsub.f32 %v230_v46, %v232_v48 }
 0x2a3   :  { %v234_v50 = vmul.f32 1.442695, %v233_v49 }
 0x2a5   :  { %285 = vpow2.f32 %v234_v50 }
 0x2ab   :  { %v286_v51 = vpop.eup %285 }
 0x2ac   :  { %236 = vadd.xlane.f32.xlu0 %v286_v51 }
 0x31f   :  { %v237_v52 = vpop.xlane.xlu0 %236 }
 0x320   :  { %287 = vlog2.f32 %v237_v52 }
 0x326   :  { %v288_v53 = vpop.eup %287 }
 0x327   :  { %v239_v54 = vmul.f32 0.6931472, %v288_v53 }
 0x329   :  { %v240_v55 = vadd.f32 %v239_v54, %v232_v48 }
 0x32b   :  { %v241_v56 = vsub.f32 %v225_v44, %v240_v55 }
 0x32d   :  { %243 = vst.msk [vmem:[#allocation11] sm:$0xff] %vm242_vm5, %v241_v56 }
 0x32e   :  { %260 = dma.vmem_to_hbm [thread:$0]  %s256_s22, 128, %s258_s25, [#allocation4]  }
 0x32f   :  { %439 = dma.done.wait [#allocation4], 128  }
 0x330   :  { %440 = vsyncadd [#allocation4], 4294967168 }
 0x331   :  { %269 = vsyncpa [#allocation3], 1 }
 0x332   :  { %270 = vsyncpa [#allocation6], 1 }
 0x333   :  { %271 = vsyncpa [#allocation9], 1 }
 0x334   :  { %272 = vsyncpa [#allocation4], 1 }

</bundles_post_ra>
